<compile_context>
chip_gen: v5e
topology: v5e:2x2
jax: 0.10.0
libtpu: 0.0.40
codegen_flags: <defaults>
</compile_context>

<pallas_src>
import numpy as np
import jax
import jax.numpy as jnp
from jax.experimental import pallas as pl
from jax.experimental.pallas import tpu as pltpu


# ----------------------------------------------------------------------------
# Host-side glue: bicubic tap weights / indices (mirrors Bicubic.contribute()).
# Shape-only scalar setup, done once in numpy and folded into dense resample
# matrices consumed by the kernel.
# ----------------------------------------------------------------------------
def _cubic_np(x):
    absx = np.abs(x)
    absx2 = absx * absx
    absx3 = absx2 * absx
    c1 = (absx <= 1).astype(np.float32)
    c2 = ((absx > 1) & (absx <= 2)).astype(np.float32)
    return ((1.5 * absx3 - 2.5 * absx2 + 1.0) * c1
            + (-0.5 * absx3 + 2.5 * absx2 - 4.0 * absx + 2.0) * c2)


def _contribute_1d(in_sz, out_sz, scale):
    """Tap weights (out, P) and 1-based source indices (out, P), as in torch."""
    kernel_width = 4.0
    if scale < 1:
        kernel_width = 4.0 / scale
    x = np.arange(1, out_sz + 1, dtype=np.float32)
    u = x / scale + 0.5 * (1.0 - 1.0 / scale)
    left = np.floor(u - kernel_width / 2.0)
    P = int(np.ceil(kernel_width) + 2)
    indice = left[:, None] + np.arange(P, dtype=np.float32)[None, :]     # (out, P)
    mid = u[:, None] - indice                                            # (out, P)
    if scale < 1:
        weight = scale * _cubic_np(mid * scale)
    else:
        weight = _cubic_np(mid)
    weight = weight / np.sum(weight, axis=1, keepdims=True)
    indice = np.clip(indice, 1.0, float(in_sz))
    keep = weight[0] != 0            # NB: mirrors the PyTorch row-0-based trim
    weight = weight[:, keep].astype(np.float32)
    indice = indice[:, keep].astype(np.int64)
    return weight, indice


def _dense_matrix(in_sz, out_sz, scale):
    """Dense (out, in) matrix equivalent to the gather+weighted-sum."""
    weight, indice = _contribute_1d(in_sz, out_sz, scale)
    W = np.zeros((out_sz, in_sz), dtype=np.float32)
    # scatter-add: duplicate clamped indices accumulate, same as the gather sum
    np.add.at(W, (np.arange(out_sz)[:, None], indice - 1), weight)
    return W


# ----------------------------------------------------------------------------
# Pallas kernel: one block of BC_TILE images -> BC_TILE (oh, ow) images.
# ----------------------------------------------------------------------------
def _bicubic_kernel(x_ref, w1t_ref, w0t_ref, o_ref):
    bc_t, h, w = x_ref.shape
    ow = w1t_ref.shape[1]
    oh = w0t_ref.shape[1]

    # 1) column resample (contract over w), batch folded into M:
    #    (BC_T*h, w) @ (w, ow)  ->  (BC_T*h, ow)        [MXU]
    x2d = x_ref[...].reshape(bc_t * h, w)                       # layout-free reshape
    t = jnp.dot(x2d, w1t_ref[...], preferred_element_type=jnp.float32)

    # 2) minor (last-two-dims) transpose of the half-size intermediate [XLU]
    t3 = jnp.transpose(t.reshape(bc_t, h, ow), (0, 2, 1))       # (BC_T, ow, h)

    # 3) row resample (contract over h), batch folded into M:
    #    (BC_T*ow, h) @ (h, oh)  ->  (BC_T*ow, oh)      [MXU]
    t2d = t3.reshape(bc_t * ow, h).astype(w0t_ref.dtype)        # layout-free reshape
    out = jnp.dot(t2d, w0t_ref[...], preferred_element_type=jnp.float32)

    # 4) minor transpose of the quarter-size result so the store is already in
    #    the final (oh, ow) layout (no extra HBM transpose pass outside) [XLU]
    out3 = jnp.transpose(out.reshape(bc_t, ow, oh), (0, 2, 1))  # (BC_T, oh, ow)
    o_ref[...] = out3.astype(o_ref.dtype)


def _choose_bc_tile(bc, per_image_bytes, budget_bytes):
    """Largest divisor of bc that fits the VMEM budget; prefer >= 2 grid steps."""
    cap = max(1, budget_bytes // max(per_image_bytes, 1))
    divisors = [t for t in range(1, bc + 1) if bc % t == 0 and t <= cap]
    if not divisors:
        return 1
    two_step = [t for t in divisors if bc // t >= 2]  # keep both v7x TCs busy
    return max(two_step) if two_step else max(divisors)


def bicubic_downsample(x, scale=0.5, *, use_bf16=False,
                       vmem_limit_bytes=48 * 1024 * 1024):
    """x: (b, c, h, w) -> (b, c, int(h*scale), int(w*scale)). Matches Bicubic.forward."""
    b, c, h, w = x.shape
    oh, ow = int(h * scale), int(w * scale)
    bc = b * c

    wt_dtype = jnp.bfloat16 if use_bf16 else jnp.float32
    w0t = jnp.asarray(_dense_matrix(h, oh, scale).T, dtype=wt_dtype)   # (h, oh)
    w1t = jnp.asarray(_dense_matrix(w, ow, scale).T, dtype=wt_dtype)   # (w, ow)

    x_flat = x.reshape(bc, h, w)
    if use_bf16:
        x_flat = x_flat.astype(jnp.bfloat16)

    # VMEM per image in a block: double-buffered input + output + f32 intermediates.
    in_isz = x_flat.dtype.itemsize
    out_isz = x.dtype.itemsize
    per_image = (2 * h * w * in_isz + 2 * oh * ow * out_isz
                 + 4 * (2 * h * ow + 2 * ow * oh))
    weight_bytes = 2 * (w0t.size + w1t.size) * np.dtype(wt_dtype).itemsize
    budget = max(vmem_limit_bytes // 2 - weight_bytes, per_image)
    bc_tile = _choose_bc_tile(bc, per_image, budget)
    grid = (bc // bc_tile,)

    # Advisory cost hint for XLA scheduling around the custom call.
    flops = 2 * bc * (h * w * ow + ow * h * oh)
    bytes_accessed = (bc * h * w * in_isz + bc * oh * ow * out_isz
                      + (w0t.size + w1t.size) * np.dtype(wt_dtype).itemsize)
    cost = pl.CostEstimate(flops=int(flops), transcendentals=0,
                           bytes_accessed=int(bytes_accessed))

    out = pl.pallas_call(
        _bicubic_kernel,
        out_shape=jax.ShapeDtypeStruct((bc, oh, ow), x.dtype),
        grid=grid,
        in_specs=[
            pl.BlockSpec((bc_tile, h, w), lambda i: (i, 0, 0)),
            pl.BlockSpec((w, ow), lambda i: (0, 0)),    # grid-invariant weights
            pl.BlockSpec((h, oh), lambda i: (0, 0)),    # grid-invariant weights
        ],
        out_specs=pl.BlockSpec((bc_tile, oh, ow), lambda i: (i, 0, 0)),
        compiler_params=pltpu.CompilerParams(
            dimension_semantics=("parallel",),
            vmem_limit_bytes=vmem_limit_bytes,
        ),
        cost_estimate=cost,
    )(x_flat, w1t, w0t)

    return out.reshape(b, c, oh, ow)


# ----------------------------------------------------------------------------
# Independent reference: numpy gather+weighted-sum mirroring the PyTorch code
# (does NOT go through the dense matrices, so it checks the matmul plumbing).
# ----------------------------------------------------------------------------
def _reference_gather_np(x_np, scale=0.5):
    b, c, h, w = x_np.shape
    oh, ow = int(h * scale), int(w * scale)
    w0, i0 = _contribute_1d(h, oh, scale)       # (oh, P0)
    w1, i1 = _contribute_1d(w, ow, scale)       # (ow, P1)
    out = (x_np[:, :, i0 - 1, :] * w0[None, None, :, :, None]).sum(axis=3)  # (b,c,oh,w)
    A = out.transpose(0, 1, 3, 2)                                           # (b,c,w,oh)
    out = (A[:, :, i1 - 1, :] * w1[None, None, :, :, None]).sum(axis=3)     # (b,c,ow,oh)
    return out.transpose(0, 1, 3, 2)                                        # (b,c,oh,ow)


if __name__ == "__main__":
    key = jax.random.PRNGKey(0)
    x = jax.random.normal(key, (2, 4, 16, 16), dtype=jnp.float32)

    out = bicubic_downsample(x, scale=0.5)
    out = jax.block_until_ready(out)

    ref = _reference_gather_np(np.asarray(x), scale=0.5)
    assert out.shape == (2, 4, 8, 8), out.shape
    err = float(np.max(np.abs(np.asarray(out) - ref)))
    assert np.allclose(np.asarray(out), ref, atol=1e-5, rtol=1e-5), err

    print("KERNEL_OK")
</pallas_src>

<mosaic_0001>
module attributes {stable_mosaic.version = 11 : i64} {
  func.func @_bicubic_kernel(%arg0: i32, %arg1: memref<4x16x16xf32, #tpu.memory_space<vmem>>, %arg2: memref<16x8xf32, #tpu.memory_space<vmem>>, %arg3: memref<16x8xf32, #tpu.memory_space<vmem>>, %arg4: memref<4x8x8xf32, #tpu.memory_space<vmem>>) attributes {dimension_semantics = [#tpu.dimension_semantics<parallel>], iteration_bounds = array<i64: 2>, scalar_prefetch = 0 : i64, scratch_operands = 0 : i64, tpu.core_type = #tpu.core_type<tc>, window_params = [{transform_indices = @transform_0, window_bounds = array<i64: 4, 16, 16>}, {pipeline_mode = #tpu.pipeline_mode<synchronous>, transform_indices = @transform_1, window_bounds = array<i64: 16, 8>}, {pipeline_mode = #tpu.pipeline_mode<synchronous>, transform_indices = @transform_2, window_bounds = array<i64: 16, 8>}, {transform_indices = @transform_3, window_bounds = array<i64: 4, 8, 8>}]} {
    %c0 = arith.constant 0 : index
    %c0_0 = arith.constant 0 : index
    %c0_1 = arith.constant 0 : index
    %0 = vector.load %arg1[%c0, %c0_0, %c0_1] : memref<4x16x16xf32, #tpu.memory_space<vmem>>, vector<4x16x16xf32>
    %1 = vector.shape_cast %0 : vector<4x16x16xf32> to vector<64x16xf32>
    %c0_2 = arith.constant 0 : index
    %c0_3 = arith.constant 0 : index
    %2 = vector.load %arg2[%c0_2, %c0_3] : memref<16x8xf32, #tpu.memory_space<vmem>>, vector<16x8xf32>
    %cst = arith.constant dense<0.000000e+00> : vector<64x8xf32>
    %3 = tpu.matmul %1, %2, %cst {dimension_numbers = #tpu.dot_dimension_numbers<[1], [0], [0], [1], [0, 0, 1, 1], [], []>} : vector<64x16xf32>, vector<16x8xf32>, vector<64x8xf32> -> vector<64x8xf32>
    %4 = vector.shape_cast %3 : vector<64x8xf32> to vector<4x16x8xf32>
    %5 = tpu.transpose %4, [0, 2, 1] : vector<4x16x8xf32> -> vector<4x8x16xf32>
    %6 = vector.shape_cast %5 : vector<4x8x16xf32> to vector<32x16xf32>
    %c0_4 = arith.constant 0 : index
    %c0_5 = arith.constant 0 : index
    %7 = vector.load %arg3[%c0_4, %c0_5] : memref<16x8xf32, #tpu.memory_space<vmem>>, vector<16x8xf32>
    %cst_6 = arith.constant dense<0.000000e+00> : vector<32x8xf32>
    %8 = tpu.matmul %6, %7, %cst_6 {dimension_numbers = #tpu.dot_dimension_numbers<[1], [0], [0], [1], [0, 0, 1, 1], [], []>} : vector<32x16xf32>, vector<16x8xf32>, vector<32x8xf32> -> vector<32x8xf32>
    %9 = vector.shape_cast %8 : vector<32x8xf32> to vector<4x8x8xf32>
    %10 = tpu.transpose %9, [0, 2, 1] : vector<4x8x8xf32> -> vector<4x8x8xf32>
    %c0_7 = arith.constant 0 : index
    %c0_8 = arith.constant 0 : index
    %c0_9 = arith.constant 0 : index
    %11 = vector.load %arg4[%c0_7, %c0_8, %c0_9] : memref<4x8x8xf32, #tpu.memory_space<vmem>>, vector<4x8x8xf32>
    tpu.vector_store %arg4[%c0_7, %c0_8, %c0_9], %10 {strides = array<i32>} : memref<4x8x8xf32, #tpu.memory_space<vmem>>, vector<4x8x8xf32>,
    return
  }
  func.func @transform_0(%arg0: i32) -> (i32, i32, i32) {
    %c0_i32 = arith.constant 0 : i32
    %c0_i32_0 = arith.constant 0 : i32
    %c0_i32_1 = arith.constant 0 : i32
    return %arg0, %c0_i32, %c0_i32_0 : i32, i32, i32
  }
  func.func @transform_1(%arg0: i32) -> (i32, i32) {
    %c0_i32 = arith.constant 0 : i32
    %c0_i32_0 = arith.constant 0 : i32
    %c0_i32_1 = arith.constant 0 : i32
    return %c0_i32, %c0_i32_0 : i32, i32
  }
  func.func @transform_2(%arg0: i32) -> (i32, i32) {
    %c0_i32 = arith.constant 0 : i32
    %c0_i32_0 = arith.constant 0 : i32
    %c0_i32_1 = arith.constant 0 : i32
    return %c0_i32, %c0_i32_0 : i32, i32
  }
  func.func @transform_3(%arg0: i32) -> (i32, i32, i32) {
    %c0_i32 = arith.constant 0 : i32
    %c0_i32_0 = arith.constant 0 : i32
    %c0_i32_1 = arith.constant 0 : i32
    return %arg0, %c0_i32, %c0_i32_0 : i32, i32, i32
  }
}

</mosaic_0001>

<bundles_post_ra>
// kernel: tpu_custom_call.1
= control target key start
LH: loop header
LB: loop body
LE: loop exit
PB: predicated region body
PF: predicated region fallthrough
CT: control target
= control target key end

     0   :  { %8 = vsyncpa [#allocation3], 0  ;;  %s1024_s0 = inlined_call_operand.hbm [shape: f32[8,16,16], index: 0, kind: input, shape index: {}]   ;;  %s1025_s1 = inlined_call_operand.vmem [shape: f32[16,8], index: 1, kind: input, shape index: {}]   ;;  %s1026_s2 = inlined_call_operand.vmem [shape: f32[16,8], index: 2, kind: input, shape index: {}]   ;;  %s1027_s3 = inlined_call_operand.hbm [shape: f32[8,8,8], index: 3, kind: output, shape index: {}]  }
   0x1   :  { %10 = vsyncpa [#allocation3 + $0x1], 0 }
   0x2   :  { %11 = vsyncpa [#allocation4], 0 }
   0x3   :  { %13 = vsyncpa [#allocation4 + $0x1], 0  ;;  %s872_s12 = smov 0   ;;  %s874_s13 = smov 0  }
   0x4   :  { %s876_s14 = smov 0   ;;  %s878_s15 = smov 0  }
   0x5 LB: > { %s893_s16 = sadd.s32 4294967295, %s846_s15   ;;  %s663_s17 = sadd.s32 4294967294, %s846_s15   ;;  %s846_s15 = sphi %s878_s15, %s1037_s15   ;;  %s842_s14 = sphi %s876_s14, %s1036_s14   ;;  %s838_s13 = sphi %s874_s13, %s1035_s13   ;;  %s834_s12 = sphi %s872_s12, %s1034_s12  }
   0x6   : > { %s897_s18 = sadd.s32 1, %s846_s15   ;;  %s26_s19 = sadd.s32 1, %s842_s14 }
   0x7   : > { %s23_s20 = ssub.s32 %s846_s15, %s897_s18  ;;  %p33_p0 = scmp.ne.s32.totalorder %s842_s14, %s838_s13 }
   0x8   : > { %p24_p1 = scmp.eq.s32.totalorder %s23_s20, 0  ;;  %p34_p2 = scmp.eq.s32.totalorder %s846_s15, 0 }
   0x9   : > { %p39_p3 = scmp.ne.s32.totalorder %s838_s13, %s834_s12  ;;  %p40_p4 = scmp.eq.s32.totalorder %s893_s16, 0 }
   0xa   : > { %s909_s21 = scalar_select %p24_p1, %s842_s14, %s26_s19  }
   0xb   : > { %p911_p5 = por %p34_p2, %p33_p0  ;;  %p915_p6 = por %p40_p4, %p39_p3 }
   0xc   : > { %p105_p7 = scmp.eq.s32.totalorder %s893_s16, 1  ;;  %p111_p8 = scmp.eq.s32.totalorder %s663_s17, 1 }
   0xd   : > { %p711_p10 = scmp.lt.s32.totalorder %s846_s15, 2  ;;  %s137_s26 = sand.u32 1, %s842_s14  }
   0xe   : > { %p922_p11 = por %p105_p7, %p33_p0  ;;  %p926_p12 = por %p111_p8, %p39_p3 }
   0xf   : > { %s691_s27 = sshll.u32 %s846_s15, 6  ;;  %s666_s28 = sshll.u32 %s137_s26, 6 }
  0x10   : > { %s147_s4 = scalar_lea.hbm %s1024_s0, %s691_s27  ;;  %s141_s6 = scalar_lea.vmem [#allocation2], %s666_s28 }
  0x11   : > { %s148_s5 = sshll.u32 %s147_s4, 4  ;;  %s150_s7 = sshll.u32 %s141_s6, 4  ;;  %s149_s5 = int_to_ptr.hbm [resolvable:$true] %s148_s5  ;;  %s151_s7 = int_to_ptr.vmem [resolvable:$true] %s150_s7 }
  0x12   : > { %p937_p13 = pnand %p711_p10, %p911_p5  ;;  %p670_p0 = scmp.ge.s32.totalorder %s846_s15, 1 }
  0x13   : > { %p158_p1 = scmp.lt.s32.totalorder %s846_s15, 3  ;;  %s138_s9 = scalar_lea.sflag [#allocation3], %s137_s26 }
  0x14   : > { %s750_s10 = sshra.s32 %s149_s5, 4  ;;  %p754_p3 = pneg %p937_p13  ;;  %s751_s10 = int_to_ptr.hbm [resolvable:$true] %s750_s10 }
  0x15   : > { %s752_s11 = scalar_lea.hbm %s751_s10, 64  ;;  %s757_s20 = scalar_lea.hbm %s1024_s0, 128 }
  0x16   : > { %p753_p2 = scmp.ne.s32.totalorder %s751_s10, %s752_s11  ;;  %p758_p5 = scmp.lt.s32.totalorder %s751_s10, %s1024_s0 }
  0x17   : > { %p759_p8 = scmp.lt.s32.totalorder %s757_s20, %s752_s11 }
  0x18   : > { %p755_p4 = pnand %p754_p3, %p753_p2 }
  0x19   : > { %p760_p10 = por %p759_p8, %p758_p5 }
  0x1a   : > { %p756_p7 = pneg %p755_p4 }
  0x1c   : > { %p761_p9 = pnand %p760_p10, %p756_p7 }
  0x1e   : > { %764 = shalt.err (!%p761_p9)
}
  0x1f   : > { %s848_s26 = smov 128   ;;  %s849_s28 = smov 8  }
  0x20   : > { %706 = dma.hbm_to_vmem [thread:$0]  (!%p937_p13), %s149_s5, 1024, %s151_s7, %s138_s9, %s848_s26, %s848_s26, %s849_s28  }
  0x21   : > { %p159_p2 = pnand %p670_p0, %p158_p1 }
  0x22   : > { %s958_s29 = sand.u32 (!%p159_p2), 1, %s838_s13  }
  0x23   : > { %162 = sbr.rel (%p159_p2) target bundleno = 655 (0x28f), region = 32  ;;  %s671_s30 = sshll.u32 (!%p159_p2), %s958_s29, 6 }
  0x24   : > { %s165_s4 = scalar_lea.sflag (!%p159_p2), [#allocation3], %s958_s29  ;;  %s168_s6 = scalar_lea.vmem (!%p159_p2), [#allocation2], %s671_s30 }
  0x28   : > { %825 = dma.done.wait (%p915_p6), %s165_s4, 1024  }
  0x29   : > { %827 = vsyncadd (%p915_p6), %s165_s4, 4294966272  ;;  %v203_v0 = vld [vmem:[%s1025_s1 + $0x8] sm:$0xff]  ;;  %v202_v1 = vld [vmem:[%s1025_s1] sm:$0xff]  ;;  %vm204_vm0 = vcmask 130048   ;;  %s672_s19 = sshll.u32 %s958_s29, 5  ;;  %vm569_vm1 = vcmask 64512  }
  0x2a   : > { %243 = vmatpush.msra.mxu0 %v203_v0  ;;  %v194_v2 = vld [vmem:[%s168_s6] sm:$0xff]  ;;  %693 = vmatpush.msra.mxu2 %v203_v0  ;;  %v197_v3 = vld [vmem:[%s168_s6 + $0x18] sm:$0xff]  ;;  %v200_v4 = vld [vmem:[%s168_s6 + $0x30] sm:$0xff]  ;;  %s191_s20 = scalar_lea.vmem [#allocation5], %s672_s19  ;;  %s692_s22 = sshll.u32 %s893_s16, 5 }
  0x2b   : > { %694 = vmatpush.msra.mxu3 %v203_v0  ;;  %v195_v5 = vld [vmem:[%s168_s6 + $0x8] sm:$0xff]  ;;  %v198_v6 = vld [vmem:[%s168_s6 + $0x20] sm:$0xff]  ;;  %v201_v7 = vld [vmem:[%s168_s6 + $0x38] sm:$0xff]  ;;  %s586_s28 = scalar_lea.hbm %s1027_s3, %s692_s22  ;;  %s587_s30 = sshll.u32 %s191_s20, 4  ;;  %s588_s30 = int_to_ptr.vmem [resolvable:$true] %s587_s30 }
  0x2c   : > { %244 = vmatpush.msra.mxu0 %v202_v1  ;;  %695 = vmatpush.msra.mxu2 %v202_v1  ;;  %v196_v8 = vld [vmem:[%s168_s6 + $0x10] sm:$0xff]  ;;  %v199_v9 = vld [vmem:[%s168_s6 + $0x28] sm:$0xff]  ;;  %v398_v11 = vld [vmem:[%s1026_s2] sm:$0xff]  ;;  %s589_s4 = sshll.u32 %s586_s28, 4  ;;  %s575_s6 = scalar_lea.sflag [#allocation4], %s958_s29  ;;  %s590_s4 = int_to_ptr.hbm [resolvable:$true] %s589_s4 }
  0x2d   : > { %673 = vmatmul.msk.f32.vlgmr.msra.gmra.mxu0 %vm204_vm0, %v194_v2  ;;  %676 = vmatmul.msk.f32.vlgmr.msra.gmra.mxu2 %vm204_vm0, %v197_v3  ;;  %v399_v10 = vld [vmem:[%s1026_s2 + $0x8] sm:$0xff]  ;;  %s794_s8 = sshra.s32 %s590_s4, 4  ;;  %s800_s9 = scalar_lea.hbm %s1027_s3, 64  ;;  %s795_s8 = int_to_ptr.hbm [resolvable:$true] %s794_s8 }
  0x2e   : > { %696 = vmatpush.msra.mxu3 %v202_v1  ;;  %426 = vmatpush.msra.mxu1 %v399_v10  ;;  %s796_s5 = scalar_lea.hbm %s795_s8, 32  ;;  %p801_p0 = scmp.lt.s32.totalorder %s795_s8, %s1027_s3 }
  0x2f   : > { %679 = vmatmul.msk.f32.vlgmr.msra.gmra.mxu3 %vm204_vm0, %v200_v4  ;;  %p797_p6 = scmp.ne.s32.totalorder %s795_s8, %s796_s5  ;;  %p802_p1 = scmp.lt.s32.totalorder %s800_s9, %s796_s5 }
  0x30   : > { %697 = vmatpush.msrb.mxu3 %v399_v10  ;;  %427 = vmatpush.msra.mxu1 %v398_v11 }
  0x31   : > { %p798_p9 = pnand %p797_p6, %p922_p11  ;;  %p803_p3 = por %p802_p1, %p801_p0 }
  0x32   : > { %698 = vmatpush.msrb.mxu3 %v398_v11 }
  0x33   : > { %p799_p13 = pneg %p798_p9 }
  0x35   : > { %674 = vmatmul.msk.f32.gmra.mxu0 %vm204_vm0, %v195_v5  ;;  %677 = vmatmul.msk.f32.gmra.mxu2 %vm204_vm0, %v198_v6  ;;  %p804_p4 = pnand %p803_p3, %p799_p13 }
  0x37   : > { %680 = vmatmul.msk.f32.gmra.mxu3 %vm204_vm0, %v201_v7 }
  0x3d   : > { %675 = vmatmul.msk.f32.gmra.mxu0 %vm204_vm0, %v196_v8  ;;  %678 = vmatmul.msk.f32.gmra.mxu2 %vm204_vm0, %v199_v9 }
  0xaa   : > { %v246_v12 = vpop.f32.mrf.mxu0 }
  0xab   : > { %270 = vxpose.xlu0.b32.start [1/2] (short) (narrow) %v246_v12, 8 }
  0xb0   : > { %v255_v13 = vpop.f32.mrf.mxu2 }
  0xb2   : > { %v249_v14 = vpop.f32.mrf.mxu0  ;;  %v264_v15 = vpop.f32.mrf.mxu3 }
  0xb3   : > { %271 = vxpose.xlu0.b32.end [2/2] (short) (narrow) %v249_v14, 8  ;;  %366 = vxpose.xlu2.b32.start [1/2] (short) (narrow) %v264_v15, 8 }
  0xb8   : > { %v258_v16 = vpop.f32.mrf.mxu2 }
  0xba   : > { %v252_v17 = vpop.f32.mrf.mxu0  ;;  %v267_v18 = vpop.f32.mrf.mxu3 }
  0xbb   : > { %302 = vxpose.xlu1.b32.start [1/2] (short) (narrow) %v252_v17, 8  ;;  %334 = vxpose.xlu0.b32.start [1/2] (short) (narrow) %v258_v16, 8 }
  0xbc   : > { %367 = vxpose.xlu2.b32.end [2/2] (short) (narrow) %v267_v18, 8 }
  0xc0   : > { %v261_v19 = vpop.f32.mrf.mxu2 }
  0xc3   : > { %303 = vxpose.xlu1.b32.end [2/2] (short) (narrow) %v255_v13, 8  ;;  %335 = vxpose.xlu0.b32.end [2/2] (short) (narrow) %v261_v19, 8 }
 0x14d   : > { %v382_v20 = vpop.trf.xlu2 }
 0x14e   : > { %684 = vmatmul.msk.f32.vlgmr.msrb.gmra.mxu3 %vm204_vm0, %v382_v20 }
 0x14f   : > { %v286_v21 = vpop.trf.xlu0 }
 0x150   : > { %681 = vmatmul.msk.f32.vlgmr.msra.gmra.mxu1 %vm204_vm0, %v286_v21 }
 0x15f   : > { %v318_v22 = vpop.trf.xlu1  ;;  %v350_v23 = vpop.trf.xlu0 }
 0x160   : > { %682 = vmatmul.msk.f32.gmra.mxu1 %vm204_vm0, %v318_v22 }
 0x168   : > { %683 = vmatmul.msk.f32.gmra.mxu1 %vm204_vm0, %v350_v23 }
 0x1cd   : > { %v429_v24 = vpop.f32.mrf.mxu1 }
 0x1ce   : > { %441 = vxpose.xlu1.b32.start.end [1/1] (short) (narrow) %v429_v24, 8 }
 0x1d1   : > { %v438_v26 = vpop.f32.mrf.mxu3 }
 0x1dd   : > { %v432_v25 = vpop.f32.mrf.mxu1 }
 0x1de   : > { %473 = vxpose.xlu2.b32.start.end [1/1] (short) (narrow) %v432_v25, 8 }
 0x1e5   : > { %v435_v27 = vpop.f32.mrf.mxu1 }
 0x1e6   : > { %505 = vxpose.xlu1.b32.start.end [1/1] (short) (narrow) %v435_v27, 8  ;;  %537 = vxpose.xlu2.b32.start.end [1/1] (short) (narrow) %v438_v26, 8 }
 0x272   : > { %v457_v28 = vpop.trf.xlu1 }
 0x273   : > { %570 = vst.msk [vmem:[%s191_s20] sm:$0xff] %vm569_vm1, %v457_v28 }
 0x277   : > { %v489_v29 = vpop.trf.xlu2 }
 0x278   : > { %571 = vst.msk [vmem:[%s191_s20 + $0x8] sm:$0xff] %vm569_vm1, %v489_v29 }
 0x27f   : > { %v553_v30 = vpop.trf.xlu2 }
 0x280   : > { %573 = vst.msk [vmem:[%s191_s20 + $0x18] sm:$0xff] %vm569_vm1, %v553_v30 }
 0x28a   : > { %v521_v31 = vpop.trf.xlu1 }
 0x28b   : > { %572 = vst.msk [vmem:[%s191_s20 + $0x10] sm:$0xff] %vm569_vm1, %v521_v31 }
 0x28c   : > { %807 = shalt.err (!%p804_p4)
}
 0x28d   : > { %s850_s29 = smov 128   ;;  %s851_s11 = smov 8  }
 0x28e   : > { %701 = dma.vmem_to_hbm [thread:$0]  (%p922_p11), %s588_s30, 512, %s590_s4, %s575_s6, %s850_s29, %s850_s29, %s851_s11  }
 0x28f PF: > { %s604_s17 = sand.u32 1, %s834_s12   ;;  %p1033_p7 = scmp.ge.s32.totalorder %s846_s15, 2 }
 0x290   : > { %s605_s19 = scalar_lea.sflag [#allocation4], %s604_s17 }
 0x291   : > { %p708_p5 = pnand %p1033_p7, %p926_p12 }
 0x293   : > { %p709_p8 = pneg %p708_p5 }
 0x295   : > { %829 = dma.done.wait (%p709_p8), %s605_s19, 512  }
 0x296   : > { %831 = vsyncadd (%p709_p8), %s605_s19, 4294966784  ;;  %p16_p10 = scmp.ge.s32.totalorder %s897_s18, 4   ;;  %s1034_s12 = smov %s838_s13 }
 0x297   : > { %s1035_s13 = smov %s842_s14  ;;  %s1036_s14 = smov %s909_s21 }
 0x298   : > { %s1037_s15 = smov %s897_s18  ;;  %18 = sbr.rel (!%p16_p10) target bundleno = 5 (0x5), region = 77 }
 0x29d   :  { %611 = vsyncpa [#allocation3], 1 }
 0x29e   :  { %613 = vsyncpa [#allocation3 + $0x1], 1 }
 0x29f   :  { %614 = vsyncpa [#allocation4], 1 }
 0x2a0   :  { %616 = vsyncpa [#allocation4 + $0x1], 1 }

</bundles_post_ra>
